<compile_context>
chip_gen: v7x
topology: tpu7x:2x2x1
jax: 0.10.0
libtpu: 0.0.40
codegen_flags: <defaults>
</compile_context>

<pallas_src>
import jax
import jax.numpy as jnp
import numpy as np
from jax.experimental import pallas as pl
from jax.experimental.pallas import tpu as pltpu


# ------------------------------ Pallas kernel ------------------------------

def conv1x1_kernel(x_ref, w_ref, b_ref, o_ref):
    # x_ref: (1, Cin, T)   one batch element, one lane-dense spatial tile
    # w_ref: (Cout, Cin)   1x1 conv weight as a dense matrix (resident)
    # b_ref: (Cout, 1)     bias, f32 (broadcast over the spatial/lane axis)
    # o_ref: (1, Cout, T)
    acc = jnp.dot(w_ref[...], x_ref[0], preferred_element_type=jnp.float32)
    o_ref[0] = (acc + b_ref[...]).astype(o_ref.dtype)


# ------------------------------ helpers -------------------------------------

def _round_up(x: int, m: int) -> int:
    return (x + m - 1) // m * m


def _pick_tile_hw(hw: int, cin: int, cout: int, x_bytes: int, out_bytes: int,
                  batch: int) -> int:
    """Pick a lane-dense spatial tile (multiple of 128) from a VMEM budget."""
    target_block_bytes = 2 * 1024 * 1024          # ~2 MiB x block -> ~85% roofline
    tile = max(128, (target_block_bytes // max(1, cin * x_bytes)) // 128 * 128)
    # Never larger than the (128-padded) image.
    tile = min(tile, _round_up(hw, 128))

    # Keep double-buffered in+out blocks comfortably inside v7x VMEM (64 MiB).
    def need(t):
        return (2 * cin * t * x_bytes
                + 2 * _round_up(cout, 8) * t * out_bytes)
    while need(tile) > 40 * 1024 * 1024 and tile > 128:
        tile = max(128, (tile // 2) // 128 * 128)

    # Guarantee >= 2 grid steps so both v7x TensorCores get work.
    while tile > 128 and batch * pl.cdiv(hw, tile) < 2:
        tile = max(128, (tile // 2) // 128 * 128)
    return tile


# ------------------------------ wrapper -------------------------------------

def pallas_outconv(x_nchw, w_oihw, bias):
    """OutConv.forward: 1x1 Conv2d. Input/output are NCHW (PyTorch layout)."""
    B, Cin, H, W = x_nchw.shape
    Cout = w_oihw.shape[0]
    HW = H * W

    out_dtype = x_nchw.dtype
    x_bytes = jnp.dtype(x_nchw.dtype).itemsize
    out_bytes = jnp.dtype(out_dtype).itemsize

    tile_hw = _pick_tile_hw(HW, Cin, Cout, x_bytes, out_bytes, B)
    hw_pad = pl.cdiv(HW, tile_hw) * tile_hw

    # Flatten spatial to the LAST (lane) dim; pad to a tile multiple so every
    # block is 128-lane aligned (unmasked stores, bounded VMEM).
    x_flat = x_nchw.reshape(B, Cin, HW)
    if hw_pad != HW:
        x_flat = jnp.pad(x_flat, ((0, 0), (0, 0), (0, hw_pad - HW)))

    w2 = w_oihw.reshape(Cout, Cin).astype(x_nchw.dtype)   # (O, I, 1, 1) -> (O, I)
    b2 = bias.reshape(Cout, 1).astype(jnp.float32)        # f32 bias add in-kernel

    # Need-based VMEM limit (double-buffered blocks + weights + slack),
    # capped well below v7x's 64 MiB physical VMEM.
    need = (2 * Cin * tile_hw * x_bytes
            + 2 * _round_up(Cout, 8) * tile_hw * out_bytes
            + _round_up(Cout, 8) * _round_up(Cin, 128) * x_bytes
            + _round_up(Cout, 8) * 128 * 4)
    vmem_limit = int(min(max(need * 2 + (4 << 20), 32 << 20), 48 << 20))

    grid = (B, hw_pad // tile_hw)
    out = pl.pallas_call(
        conv1x1_kernel,
        out_shape=jax.ShapeDtypeStruct((B, Cout, hw_pad), out_dtype),
        grid=grid,
        in_specs=[
            pl.BlockSpec((1, Cin, tile_hw), lambda b, t: (b, 0, t)),
            pl.BlockSpec((Cout, Cin), lambda b, t: (0, 0)),
            pl.BlockSpec((Cout, 1), lambda b, t: (0, 0)),
        ],
        out_specs=pl.BlockSpec((1, Cout, tile_hw), lambda b, t: (b, 0, t)),
        compiler_params=pltpu.CompilerParams(
            dimension_semantics=("parallel", "parallel"),
            vmem_limit_bytes=vmem_limit,
        ),
    )(x_flat, w2, b2)

    if hw_pad != HW:
        out = out[:, :, :HW]
    return out.reshape(B, Cout, H, W)


# ------------------------------ reference ------------------------------------

def ref_outconv(x_nchw, w_oihw, bias):
    """Pure-JAX reference mirroring nn.Conv2d(in_ch, out_ch, 1) forward."""
    y = jax.lax.conv_general_dilated(
        x_nchw, w_oihw, (1, 1), "VALID",
        dimension_numbers=("NCHW", "OIHW", "NCHW"))
    return y + bias.reshape(1, -1, 1, 1)


# ------------------------------ main ------------------------------------------

if __name__ == "__main__":
    key = jax.random.PRNGKey(0)
    B, in_ch, out_ch, H, W = 2, 8, 4, 16, 16     # OutConv(in_ch=8, out_ch=4)

    kx, kw, kb = jax.random.split(key, 3)
    x = jax.random.normal(kx, (B, in_ch, H, W), jnp.float32)
    w = 0.1 * jax.random.normal(kw, (out_ch, in_ch, 1, 1), jnp.float32)
    b = 0.1 * jax.random.normal(kb, (out_ch,), jnp.float32)

    out = jax.jit(pallas_outconv)(x, w, b)
    out = jax.block_until_ready(out)
    assert out.shape == (B, out_ch, H, W), out.shape

    ref = jax.block_until_ready(ref_outconv(x, w, b))
    np.testing.assert_allclose(np.asarray(out), np.asarray(ref),
                               atol=1e-4, rtol=1e-4)

    # Also exercise a shape whose H*W is NOT a multiple of 128 (padding path).
    x2 = jax.random.normal(kx, (1, in_ch, 28, 28), jnp.float32)
    out2 = jax.block_until_ready(jax.jit(pallas_outconv)(x2, w, b))
    ref2 = jax.block_until_ready(ref_outconv(x2, w, b))
    np.testing.assert_allclose(np.asarray(out2), np.asarray(ref2),
                               atol=1e-4, rtol=1e-4)

    print("KERNEL_OK")
</pallas_src>

<mosaic_0001>
module attributes {stable_mosaic.version = 11 : i64} {
  func.func @conv1x1_kernel(%arg0: i32, %arg1: i32, %arg2: memref<1x8x256xf32, #tpu.memory_space<vmem>>, %arg3: memref<4x8xf32, #tpu.memory_space<vmem>>, %arg4: memref<4x1xf32, #tpu.memory_space<vmem>>, %arg5: memref<1x4x256xf32, #tpu.memory_space<vmem>>) attributes {dimension_semantics = [#tpu.dimension_semantics<parallel>, #tpu.dimension_semantics<parallel>], iteration_bounds = array<i64: 2, 1>, scalar_prefetch = 0 : i64, scratch_operands = 0 : i64, tpu.core_type = #tpu.core_type<tc>, window_params = [{transform_indices = @transform_0, window_bounds = array<i64: 1, 8, 256>}, {pipeline_mode = #tpu.pipeline_mode<synchronous>, transform_indices = @transform_1, window_bounds = array<i64: 4, 8>}, {pipeline_mode = #tpu.pipeline_mode<synchronous>, transform_indices = @transform_2, window_bounds = array<i64: 4, 1>}, {transform_indices = @transform_3, window_bounds = array<i64: 1, 4, 256>}]} {
    %c0 = arith.constant 0 : index
    %c0_0 = arith.constant 0 : index
    %0 = vector.load %arg3[%c0, %c0_0] : memref<4x8xf32, #tpu.memory_space<vmem>>, vector<4x8xf32>
    %c0_1 = arith.constant 0 : index
    %c0_2 = arith.constant 0 : index
    %c0_3 = arith.constant 0 : index
    %1 = vector.load %arg2[%c0_1, %c0_2, %c0_3] : memref<1x8x256xf32, #tpu.memory_space<vmem>>, vector<1x8x256xf32>
    %2 = vector.shape_cast %1 : vector<1x8x256xf32> to vector<8x256xf32>
    %cst = arith.constant dense<0.000000e+00> : vector<4x256xf32>
    %3 = tpu.matmul %0, %2, %cst {dimension_numbers = #tpu.dot_dimension_numbers<[1], [0], [0], [1], [0, 0, 1, 1], [], []>} : vector<4x8xf32>, vector<8x256xf32>, vector<4x256xf32> -> vector<4x256xf32>
    %c0_4 = arith.constant 0 : index
    %c0_5 = arith.constant 0 : index
    %4 = vector.load %arg4[%c0_4, %c0_5] : memref<4x1xf32, #tpu.memory_space<vmem>>, vector<4x1xf32>
    %5 = vector.broadcast %4 : vector<4x1xf32> to vector<4x256xf32>
    %6 = arith.addf %3, %5 : vector<4x256xf32>
    %c0_6 = arith.constant 0 : index
    %c0_7 = arith.constant 0 : index
    %c0_8 = arith.constant 0 : index
    %7 = vector.load %arg5[%c0_6, %c0_7, %c0_8] : memref<1x4x256xf32, #tpu.memory_space<vmem>>, vector<1x4x256xf32>
    %8 = vector.shape_cast %7 : vector<1x4x256xf32> to vector<4x256xf32>
    %9 = vector.shape_cast %6 : vector<4x256xf32> to vector<1x4x256xf32>
    tpu.vector_store %arg5[%c0_6, %c0_7, %c0_8], %9 {strides = array<i32>} : memref<1x4x256xf32, #tpu.memory_space<vmem>>, vector<1x4x256xf32>,
    return
  }
  func.func @transform_0(%arg0: i32, %arg1: i32) -> (i32, i32, i32) {
    %c0_i32 = arith.constant 0 : i32
    %c0_i32_0 = arith.constant 0 : i32
    return %arg0, %c0_i32, %arg1 : i32, i32, i32
  }
  func.func @transform_1(%arg0: i32, %arg1: i32) -> (i32, i32) {
    %c0_i32 = arith.constant 0 : i32
    %c0_i32_0 = arith.constant 0 : i32
    %c0_i32_1 = arith.constant 0 : i32
    return %c0_i32, %c0_i32_0 : i32, i32
  }
  func.func @transform_2(%arg0: i32, %arg1: i32) -> (i32, i32) {
    %c0_i32 = arith.constant 0 : i32
    %c0_i32_0 = arith.constant 0 : i32
    %c0_i32_1 = arith.constant 0 : i32
    return %c0_i32, %c0_i32_0 : i32, i32
  }
  func.func @transform_3(%arg0: i32, %arg1: i32) -> (i32, i32, i32) {
    %c0_i32 = arith.constant 0 : i32
    %c0_i32_0 = arith.constant 0 : i32
    return %arg0, %c0_i32, %arg1 : i32, i32, i32
  }
}

</mosaic_0001>

<bundles_post_ra>
// kernel: pallas_outconv.1
= control target key start
LH: loop header
LB: loop body
LE: loop exit
PB: predicated region body
PF: predicated region fallthrough
CT: control target
= control target key end

     0   :  { %s473_s12 = smov 0   ;;  %s475_s13 = smov 0   ;;  %s512_s0 = inlined_call_operand.vmem [shape: f32[2,8,256], index: 0, kind: input, shape index: {}]   ;;  %s513_s1 = inlined_call_operand.vmem [shape: f32[4,8], index: 1, kind: input, shape index: {}]   ;;  %s514_s2 = inlined_call_operand.vmem [shape: f32[4,1], index: 2, kind: input, shape index: {}]   ;;  %s515_s3 = inlined_call_operand.vmem [shape: f32[2,4,256], index: 3, kind: output, shape index: {}]  }
   0x1   :  { %s477_s14 = smov 0  }
   0x2 LB: > { %s25_s15 = sadd.s32 1, %s445_s13  ;;  %p390_p0 = scmp.ge.s32.totalorder %s449_s14, 1  ;;  %s449_s14 = sphi %s477_s14, %s13_s14   ;;  %s445_s13 = sphi %s475_s13, %s517_s13   ;;  %s441_s12 = sphi %s473_s12, %s516_s12  }
   0x3   : > { %p27_p1 = scmp.ge.s32.totalorder %s25_s15, 2  ;;  %p158_p2 = scmp.lt.s32.totalorder %s449_s14, 3 }
   0x5   : > { %s519_s15 = smov (%p27_p1, %s25_s15), 0  ;;  %p159_p3 = pnand %p390_p0, %p158_p2 }
   0x6   : > { %p191_p4 = scmp.lt.s32.totalorder (!%p159_p3), %s441_s12, 1  ;;  %v451_v0 = vmov (!%p159_p3), 0.0   ;;  %v452_v1 = vmov (!%p159_p3), 0   ;;  %v213_v2 = vld [vmem:[%s514_s2] sm:$0xf] (!%p159_p3)  ;;  %vm219_vm0 = vcmask (!%p159_p3), 64512  }
   0x7   : > { %162 = sbr.rel (%p159_p3) target bundleno = 238 (0xee), region = 32  ;;  %287 = vmatprep.mubr.f32.mxu0 (!%p159_p3), %v451_v0  ;;  %426 = vset.pattern.permute.xlu0 (!%p159_p3), %v452_v1  ;;  %v210_v5 = vld [vmem:[%s513_s1] sm:$0xf] (!%p159_p3) }
   0x8   : > { %216 = vperm.xlu0 (!%p159_p3), %426, %v213_v2  }
   0xe   : > { %s521_s12 = smov (!%p191_p4, %s441_s12), 1 }
   0xf   : > { %s398_s18 = sshll.u32 %s521_s12, 4  ;;  %s399_s24 = sshll.u32 %s521_s12, 3 }
  0x10   : > { %s198_s21 = scalar_lea.vmem %s512_s0, %s398_s18  ;;  %s208_s27 = scalar_lea.vmem %s515_s3, %s399_s24 }
  0x11   : > { %v212_v3 = vld [vmem:[%s198_s21 + $0x8] sm:$0xff]  ;;  %v211_v4 = vld [vmem:[%s198_s21] sm:$0xff] }
  0x12   : > { %223 = vmatprep.subr.mxu0 %v212_v3 }
  0x13   : > { %224 = vmatpush1.msra.mxu0 %v211_v4 }
  0x14   : > { %395 = vmatmul.mubr.msk.f32.vlgmr.msra.gmra.mrb[0].mxu0 %vm219_vm0, %v210_v5 }
  0x87   : > { %v217_v6 = vpop.permute.xlu0 %216 }
  0xe7   : > { %v289_v7 = vpop.f32.mrb[0].mxu0 }
  0xe8   : > { %v290_v8 = vadd.f32 %v289_v7, %v217_v6  ;;  %v291_v9 = vpop.f32.mrb[1].mxu0 }
  0xe9   : > { %v292_v10 = vadd.f32 %v291_v9, %v217_v6 }
  0xeb   : > { %v296_v11 = vcombine.low %v290_v8, %v292_v10 }
  0xed   : > { %298 = vst [vmem:[%s208_s27] sm:$0xff] %v296_v11 }
  0xee PF: > { %s13_s14 = sadd.s32 1, %s449_s14   ;;  %s516_s12 = smov %s445_s13 }
  0xef   : > { %p10_p5 = scmp.ge.s32.totalorder %s13_s14, 4   ;;  %s517_s13 = smov %s519_s15 }
  0xf1   :  { %12 = sbr.rel (!%p10_p5) target bundleno = 2 (0x2), region = 62 }

</bundles_post_ra>
